<compile_context>
chip_gen: v7x
topology: tpu7x:2x2x1
jax: 0.10.0
libtpu: 0.0.40
codegen_flags: <defaults>
</compile_context>

<pallas_src>
import math

import jax
import jax.numpy as jnp
from jax.experimental import pallas as pl
from jax.experimental.pallas import tpu as pltpu

_LANE = 128
_SUBLANE = 8
_MIN_KERNEL_ELEMS = _SUBLANE * _LANE  # below one (8,128) tile -> plain jnp.where


def _discretize_kernel(x_ref, o_ref):
    # (x >= 0) ? +1 : -1  -- a single VPU select; cast via the constants' dtype.
    one = jnp.ones((), dtype=o_ref.dtype)
    o_ref[...] = jnp.where(x_ref[...] >= 0, one, -one)


def _round_up(x: int, m: int) -> int:
    return ((x + m - 1) // m) * m


def _default_block_rows() -> int:
    """Rows (of 128 lanes) per block, tuned per TPU generation."""
    try:
        kind = jax.devices()[0].device_kind.lower()
    except Exception:  # pragma: no cover - defensive
        kind = ""
    if "v5" in kind:
        # v5e: 16 MiB default scoped VMEM and ~0.8 TB/s HBM -> modest blocks.
        target_elems = 512 * 1024
    elif "7" in kind:
        # v7x: ~3.2 TB/s HBM -> bigger blocks amortize the ~0.35us/step overhead.
        target_elems = 1536 * 1024
    else:
        # v6e / unknown: 32 MiB default scoped VMEM, ~1.4 TB/s HBM.
        target_elems = 1024 * 1024
    rows = max(_SUBLANE, target_elems // _LANE)
    return (rows // _SUBLANE) * _SUBLANE


def discretize_pallas(
    proba: jax.Array,
    *,
    block_rows: int | None = None,
    out_dtype=jnp.float32,
    donate_input: bool = False,
) -> jax.Array:
    """Elementwise sign-discretize: where(x >= 0, +1, -1), default float32 out."""
    orig_shape = proba.shape
    n = math.prod(orig_shape) if orig_shape else 1

    if n == 0:
        return jnp.zeros(orig_shape, out_dtype)

    flat = proba.reshape(-1)
    one = jnp.ones((), out_dtype)

    # Small or lane-ragged inputs: a fused jnp.where avoids the kernel launch,
    # the extra HBM materialization, and any sublane-1 layout for the tail.
    if n < _MIN_KERNEL_ELEMS or n % _LANE != 0:
        return jnp.where(flat >= 0, one, -one).reshape(orig_shape)

    rows = n // _LANE
    # Metadata-only view: (rows, 128) packs perfectly into (8,128) vregs and
    # each block of consecutive rows is a contiguous HBM chunk.
    x2d = flat.reshape(rows, _LANE)

    in_bytes = jnp.dtype(proba.dtype).itemsize
    out_bytes = jnp.dtype(out_dtype).itemsize

    if block_rows is None:
        block_rows = _default_block_rows()
    # Keep >= 2 grid steps when possible so v7x's two TensorCores both get work,
    # never exceed the (sublane-padded) row count, and stay a multiple of 8.
    block_rows = min(block_rows, _round_up(pl.cdiv(rows, 2), _SUBLANE),
                     _round_up(rows, _SUBLANE))
    block_rows = max(_SUBLANE, (block_rows // _SUBLANE) * _SUBLANE)

    grid = (pl.cdiv(rows, block_rows),)

    # Double-buffered in + out blocks; cap at 48 MiB (v7x: 64 MiB physical/TC).
    vmem_need = 2 * block_rows * _LANE * (in_bytes + out_bytes)
    vmem_limit = int(min(48 << 20, max(vmem_need + (16 << 20), 32 << 20)))

    io_aliases = {}
    if donate_input and proba.dtype == jnp.dtype(out_dtype):
        io_aliases = {0: 0}

    out2d = pl.pallas_call(
        _discretize_kernel,
        out_shape=jax.ShapeDtypeStruct((rows, _LANE), out_dtype),
        grid_spec=pltpu.PrefetchScalarGridSpec(
            num_scalar_prefetch=0,
            grid=grid,
            in_specs=[pl.BlockSpec((block_rows, _LANE), lambda i: (i, 0))],
            out_specs=pl.BlockSpec((block_rows, _LANE), lambda i: (i, 0)),
        ),
        compiler_params=pltpu.CompilerParams(
            dimension_semantics=("parallel",),
            vmem_limit_bytes=vmem_limit,
        ),
        cost_estimate=pl.CostEstimate(
            flops=n, transcendentals=0,
            bytes_accessed=n * (in_bytes + out_bytes),
        ),
        input_output_aliases=io_aliases,
    )(x2d)

    return out2d.reshape(orig_shape)


if __name__ == "__main__":
    key = jax.random.PRNGKey(0)

    # NCHW-style activation map: [2, 4, 16, 16] -> 2048 elems, kernel path
    # (rows=16, block_rows=8, 2 grid steps).
    x = jax.random.normal(key, (2, 4, 16, 16), dtype=jnp.float32)
    # Include the tricky values: -0.0 -> +1, NaN -> -1 (matches the PyTorch formula).
    x = x.at[0, 0, 0, 0].set(-0.0)
    x = x.at[0, 0, 0, 1].set(jnp.nan)
    out = jax.block_until_ready(discretize_pallas(x))

    ref = jnp.where(x >= 0.0, 1.0, 0.0) * 2.0 - 1.0  # plain-JAX mirror of PyTorch
    assert out.shape == x.shape
    assert out.dtype == jnp.float32
    assert bool(jnp.all(out == ref))

    # Ragged-rows kernel path: n = 1920 -> rows = 15 (last block clipped).
    y = jax.random.normal(jax.random.PRNGKey(1), (5, 384), dtype=jnp.float32)
    out_y = jax.block_until_ready(discretize_pallas(y))
    ref_y = jnp.where(y >= 0.0, 1.0, 0.0) * 2.0 - 1.0
    assert out_y.dtype == jnp.float32
    assert bool(jnp.all(out_y == ref_y))

    # Doctest-style 1-D example: [-0.5, 0.0, 0.5] -> [-1, 1, 1] (small-input
    # fallback path; same semantics).
    proba = jnp.array([-0.5, 0.0, 0.5], dtype=jnp.float32)
    binary = jax.block_until_ready(discretize_pallas(proba))
    assert binary.dtype == jnp.float32
    assert bool(jnp.all(binary == jnp.array([-1.0, 1.0, 1.0], jnp.float32)))

    print("KERNEL_OK")
</pallas_src>

<mosaic_0001>
module attributes {stable_mosaic.version = 11 : i64} {
  func.func @_discretize_kernel(%arg0: i32, %arg1: memref<8x128xf32, #tpu.memory_space<vmem>>, %arg2: memref<8x128xf32, #tpu.memory_space<vmem>>) attributes {dimension_semantics = [#tpu.dimension_semantics<parallel>], iteration_bounds = array<i64: 2>, scalar_prefetch = 0 : i64, scratch_operands = 0 : i64, tpu.core_type = #tpu.core_type<tc>, window_params = [{transform_indices = @transform_0, window_bounds = array<i64: 8, 128>}, {transform_indices = @transform_1, window_bounds = array<i64: 8, 128>}]} {
    %c0 = arith.constant 0 : index
    %c0_0 = arith.constant 0 : index
    %0 = vector.load %arg1[%c0, %c0_0] : memref<8x128xf32, #tpu.memory_space<vmem>>, vector<8x128xf32>
    %cst = arith.constant 0.000000e+00 : f32
    %1 = vector.broadcast %cst : f32 to vector<8x128xf32>
    %2 = arith.cmpf oge, %0, %1 : vector<8x128xf32>
    %cst_1 = arith.constant 0.000000e+00 : f32
    %cst_2 = arith.constant 1.000000e+00 : f32
    %3 = arith.subf %cst_1, %cst_2 : f32
    %cst_3 = arith.constant 1.000000e+00 : f32
    %4 = vector.broadcast %cst_3 : f32 to vector<8x128xf32>
    %5 = vector.broadcast %3 : f32 to vector<8x128xf32>
    %6 = arith.select %2, %4, %5 : vector<8x128xi1>, vector<8x128xf32>
    %c0_4 = arith.constant 0 : index
    %c0_5 = arith.constant 0 : index
    %7 = vector.load %arg2[%c0_4, %c0_5] : memref<8x128xf32, #tpu.memory_space<vmem>>, vector<8x128xf32>
    tpu.vector_store %arg2[%c0_4, %c0_5], %6 {strides = array<i32>} : memref<8x128xf32, #tpu.memory_space<vmem>>, vector<8x128xf32>,
    return
  }
  func.func @transform_0(%arg0: i32) -> (i32, i32) {
    %c0_i32 = arith.constant 0 : i32
    %c0_i32_0 = arith.constant 0 : i32
    return %arg0, %c0_i32 : i32, i32
  }
  func.func @transform_1(%arg0: i32) -> (i32, i32) {
    %c0_i32 = arith.constant 0 : i32
    %c0_i32_0 = arith.constant 0 : i32
    return %arg0, %c0_i32 : i32, i32
  }
}

</mosaic_0001>

<bundles_post_ra>
// kernel: tpu_custom_call.1
= control target key start
LH: loop header
LB: loop body
LE: loop exit
PB: predicated region body
PF: predicated region fallthrough
CT: control target
= control target key end

     0   :  { %6 = vsyncpa [#allocation3], 0  ;;  %s551_s0 = inlined_call_operand.hbm [shape: f32[16,128], index: 0, kind: input, shape index: {}]   ;;  %s552_s1 = inlined_call_operand.hbm [shape: f32[16,128], index: 1, kind: output, shape index: {}]  }
   0x1   :  { %8 = vsyncpa [#allocation3 + $0x1], 0 }
   0x2   :  { %9 = vsyncpa [#allocation4], 0 }
   0x3   :  { %11 = vsyncpa [#allocation4 + $0x1], 0  ;;  %s390_s6 = smov 0   ;;  %s392_s7 = smov 0  }
   0x4   :  { %s394_s8 = smov 0   ;;  %s396_s9 = smov 0  }
   0x5 LB: > { %s411_s10 = sadd.s32 4294967295, %s375_s9   ;;  %s220_s11 = sadd.s32 4294967294, %s375_s9   ;;  %s375_s9 = sphi %s396_s9, %s567_s9   ;;  %s371_s8 = sphi %s394_s8, %s566_s8   ;;  %s367_s7 = sphi %s392_s7, %s565_s7   ;;  %s363_s6 = sphi %s390_s6, %s564_s6  }
   0x6   : > { %s415_s12 = sadd.s32 1, %s375_s9   ;;  %s24_s13 = sadd.s32 1, %s371_s8 }
   0x7   : > { %s21_s14 = ssub.s32 %s375_s9, %s415_s12  ;;  %p31_p0 = scmp.ne.s32.totalorder %s371_s8, %s367_s7 }
   0x8   : > { %p22_p1 = scmp.eq.s32.totalorder %s21_s14, 0  ;;  %p32_p2 = scmp.eq.s32.totalorder %s375_s9, 0 }
   0x9   : > { %p37_p3 = scmp.ne.s32.totalorder %s367_s7, %s363_s6  ;;  %p38_p4 = scmp.eq.s32.totalorder %s411_s10, 0 }
   0xa   : > { %s427_s15 = scalar_select %p22_p1, %s371_s8, %s24_s13  }
   0xb   : > { %p429_p5 = por %p32_p2, %p31_p0  ;;  %p433_p6 = por %p38_p4, %p37_p3 }
   0xc   : > { %p61_p7 = scmp.eq.s32.totalorder %s411_s10, 1  ;;  %p67_p8 = scmp.eq.s32.totalorder %s220_s11, 1 }
   0xd   : > { %p244_p10 = scmp.lt.s32.totalorder %s375_s9, 2  ;;  %s87_s20 = sand.u32 1, %s371_s8  }
   0xe   : > { %p440_p11 = por %p61_p7, %p31_p0  ;;  %p444_p12 = por %p67_p8, %p37_p3 }
   0xf   : > { %s224_s21 = sshll.u32 %s375_s9, 7  ;;  %s223_s22 = sshll.u32 %s87_s20, 3 }
  0x10   : > { %s556_s18 = scalar_select %p440_p11, 1, 0 }
  0x11   : > { %s557_s19 = scalar_select %p444_p12, 1, 0 }
  0x12   : > { %s453_s25 = scalar_lea.hbm %s551_s0, %s224_s21  ;;  %s91_s26 = scalar_lea.vmem [#allocation2], %s223_s22 }
  0x13   : > { %s98_s27 = sshll.u32 %s91_s26, 4  ;;  %p457_p13 = pnand %p244_p10, %p429_p5  ;;  %s461_s27 = int_to_ptr.vmem [resolvable:$true] %s98_s27 }
  0x14   : > { %s88_s29 = scalar_lea.sflag [#allocation3], %s87_s20  ;;  %s279_s30 = scalar_lea.hbm %s453_s25, 128 }
  0x15   : > { %p280_p2 = scmp.ne.s32.totalorder %s453_s25, %s279_s30  ;;  %p281_p3 = pneg %p457_p13 }
  0x16   : > { %s284_s4 = scalar_lea.hbm %s551_s0, 256  ;;  %p285_p5 = scmp.lt.u32.totalorder %s453_s25, %s551_s0 }
  0x17   : > { %p282_p4 = pnand %p281_p3, %p280_p2  ;;  %p286_p8 = scmp.lt.u32.totalorder %s284_s4, %s279_s30 }
  0x18   : > { %p288_p9 = scmp.lt.u32.totalorder %s279_s30, %s453_s25 }
  0x19   : > { %p283_p7 = pneg %p282_p4  ;;  %p287_p10 = por %p286_p8, %p285_p5 }
  0x1b   : > { %p289_p0 = por %p288_p9, %p287_p10 }
  0x1d   : > { %p290_p1 = pnand %p289_p0, %p283_p7 }
  0x1f   : > { %293 = shalt.err (!%p290_p1)
}
  0x20   : > { %s294_s13 = scalar_lea.vmem %s461_s27, 128  ;;  %s377_s14 = smov [#allocation2]  }
  0x21   : > { %p295_p2 = scmp.ne.s32.totalorder %s461_s27, %s294_s13  ;;  %s299_s16 = sshll.u32 %s377_s14, 4  ;;  %s300_s16 = int_to_ptr.vmem [resolvable:$false] %s299_s16 }
  0x22   : > { %s301_s20 = scalar_lea.vmem %s300_s16, 256  ;;  %p302_p11 = scmp.lt.s32.totalorder %s461_s27, %s300_s16 }
  0x23   : > { %p297_p4 = pnand %p295_p2, %p281_p3  ;;  %p303_p5 = scmp.lt.s32.totalorder %s301_s20, %s294_s13 }
  0x25   : > { %p298_p12 = pneg %p297_p4  ;;  %p304_p8 = por %p303_p5, %p302_p11 }
  0x27   : > { %p305_p9 = pnand %p304_p8, %p298_p12 }
  0x29   : > { %308 = shalt.err (!%p305_p9)
}
  0x2a   : > { %239 = dma.hbm_to_vmem [thread:$0]  (!%p457_p13), %s453_s25, 128, %s461_s27, %s88_s29  }
  0x2b   : > { %p559_p0 = scmp.lt.s32.totalorder %s375_s9, 3  ;;  %p560_p1 = scmp.ge.s32.totalorder %s375_s9, 1 }
  0x2d   : > { %p104_p3 = pnand %p560_p1, %p559_p0 }
  0x2e   : > { %s495_s21 = sand.u32 (!%p104_p3), 1, %s367_s7  }
  0x2f   : > { %107 = sbr.rel (%p104_p3) target bundleno = 81 (0x51), region = 24  ;;  %s226_s22 = sshll.u32 (!%p104_p3), %s495_s21, 3 }
  0x30   : > { %s110_s23 = scalar_lea.sflag (!%p104_p3), [#allocation3], %s495_s21  ;;  %s113_s24 = scalar_lea.vmem (!%p104_p3), [#allocation2], %s226_s22 }
  0x36   : > { %354 = dma.done.wait (%p433_p6), %s110_s23, 128  }
  0x37   : > { %356 = vsyncadd (%p433_p6), %s110_s23, 4294967168  ;;  %s131_s25 = scalar_lea.vmem [#allocation5], %s226_s22  ;;  %s229_s27 = sshll.u32 %s411_s10, 7  ;;  %v132_v0 = vld [vmem:[%s113_s24] sm:$0xff]  ;;  %v378_v1 = vmov -1.0  }
  0x38   : > { %s150_s26 = sshll.u32 %s131_s25, 4  ;;  %vm133_vm0 = vcmp.ge.f32.partialorder %v132_v0, 0.0  ;;  %s509_s30 = scalar_lea.hbm %s552_s1, %s229_s27  ;;  %s504_s26 = int_to_ptr.vmem [resolvable:$true] %s150_s26 }
  0x39   : > { %v134_v2 = vsel %vm133_vm0, 1.0, %v378_v1  ;;  %s137_s17 = scalar_lea.sflag [#allocation4], %s495_s21  ;;  %s309_s2 = scalar_lea.vmem %s504_s26, 128 }
  0x3a   : > { %135 = vst [vmem:[%s131_s25] sm:$0xff] %v134_v2  ;;  %p310_p6 = scmp.ne.s32.totalorder %s504_s26, %s309_s2  ;;  %p561_p11 = scmp.ne.s32.totalorder %s556_s18, 0 }
  0x3b   : > { %s379_s10 = smov [#allocation5]  }
  0x3c   : > { %p311_p12 = pnand %p310_p6, %p561_p11  ;;  %s313_s3 = sshll.u32 %s379_s10, 4  ;;  %s314_s3 = int_to_ptr.vmem [resolvable:$false] %s313_s3 }
  0x3d   : > { %s315_s4 = scalar_lea.vmem %s314_s3, 256  ;;  %p316_p7 = scmp.lt.s32.totalorder %s504_s26, %s314_s3 }
  0x3e   : > { %p312_p13 = pneg %p311_p12  ;;  %p317_p10 = scmp.lt.s32.totalorder %s315_s4, %s309_s2 }
  0x40   : > { %p318_p2 = por %p317_p10, %p316_p7 }
  0x42   : > { %p319_p4 = pnand %p318_p2, %p312_p13 }
  0x44   : > { %322 = shalt.err (!%p319_p4)
}
  0x45   : > { %s323_s5 = scalar_lea.hbm %s509_s30, 128  ;;  %s327_s14 = scalar_lea.hbm %s552_s1, 256 }
  0x46   : > { %p324_p5 = scmp.ne.s32.totalorder %s509_s30, %s323_s5  ;;  %p328_p0 = scmp.lt.u32.totalorder %s509_s30, %s552_s1 }
  0x47   : > { %p329_p1 = scmp.lt.u32.totalorder %s327_s14, %s323_s5  ;;  %p331_p6 = scmp.lt.u32.totalorder %s323_s5, %s509_s30 }
  0x48   : > { %p325_p8 = pnand %p324_p5, %p561_p11 }
  0x49   : > { %p330_p3 = por %p329_p1, %p328_p0 }
  0x4a   : > { %p326_p9 = pneg %p325_p8 }
  0x4b   : > { %p332_p12 = por %p331_p6, %p330_p3 }
  0x4d   : > { %p333_p13 = pnand %p332_p12, %p326_p9 }
  0x4f   : > { %336 = shalt.err (!%p333_p13)
}
  0x50   : > { %234 = dma.vmem_to_hbm [thread:$0]  (%p561_p11), %s504_s26, 128, %s509_s30, %s137_s17  }
  0x51 PF: > { %s162_s21 = sand.u32 1, %s363_s6   ;;  %p562_p7 = scmp.ne.s32.totalorder %s557_s19, 0 }
  0x52   : > { %p563_p10 = scmp.ge.s32.totalorder %s375_s9, 2  ;;  %s163_s22 = scalar_lea.sflag [#allocation4], %s162_s21 }
  0x54   : > { %p241_p2 = pnand %p563_p10, %p562_p7 }
  0x56   : > { %358 = dma.done.wait (!%p241_p2), %s163_s22, 128  }
  0x57   : > { %360 = vsyncadd (!%p241_p2), %s163_s22, 4294967168  ;;  %p14_p4 = scmp.ge.s32.totalorder %s415_s12, 4   ;;  %s564_s6 = smov %s367_s7 }
  0x58   : > { %s565_s7 = smov %s371_s8  ;;  %s566_s8 = smov %s427_s15 }
  0x59   : > { %s567_s9 = smov %s415_s12  ;;  %16 = sbr.rel (!%p14_p4) target bundleno = 5 (0x5), region = 69 }
  0x60   :  { %168 = vsyncpa [#allocation3], 1 }
  0x61   :  { %170 = vsyncpa [#allocation3 + $0x1], 1 }
  0x62   :  { %171 = vsyncpa [#allocation4], 1 }
  0x63   :  { %173 = vsyncpa [#allocation4 + $0x1], 1 }

</bundles_post_ra>
